<compile_context>
chip_gen: v6e
topology: v6e:2x2x1
jax: 0.10.0
libtpu: 0.0.40
codegen_flags: <defaults>
</compile_context>

<pallas_src>
import functools

import jax
import jax.numpy as jnp
from jax.experimental import pallas as pl
from jax.experimental.pallas import tpu as pltpu


def _round_up(n, m):
    return ((n + m - 1) // m) * m


def _pick_batch_tile(batch, batch_tile):
    """Batch tile: multiple of 8, <= batch_tile, and >= 2 grid steps if batch > 8."""
    if batch <= 8:
        return batch  # single full-dim block (legal for any batch)
    half = _round_up((batch + 1) // 2, 8)  # ensures grid_b >= 2 (v7x megacore)
    return max(8, min(batch_tile, half))


def _mlp_softmax_kernel(x_ref, w1_ref, b1_ref, w2_ref, b2_ref, w3_ref, b3_ref,
                        o_ref):
    x = x_ref[...]  # (bt, input_size) f32, native width

    # Layer 1: Linear(input, hidden) + ReLU      (Dropout(0.3) -> identity)
    h1 = jnp.dot(x, w1_ref[...], preferred_element_type=jnp.float32)
    h1 = jnp.maximum(h1 + b1_ref[...], 0.0)

    # Layer 2: Linear(hidden, hidden) + ReLU     (Dropout(0.2) -> identity)
    h2 = jnp.dot(h1, w2_ref[...], preferred_element_type=jnp.float32)
    h2 = jnp.maximum(h2 + b2_ref[...], 0.0)

    # Layer 3: Linear(hidden, output) — padded class columns carry bias -1e30,
    # so exp underflows to exactly 0 for them and the row sums are unchanged.
    logits = jnp.dot(h2, w3_ref[...], preferred_element_type=jnp.float32)
    logits = logits + b3_ref[...]

    # Softmax over the (lane-padded) class axis, exact normalization.
    m = jnp.max(logits, axis=-1, keepdims=True)
    e = jnp.exp(logits - m)
    s = jnp.sum(e, axis=-1, keepdims=True)
    probs = e / s  # exact divide: rows sum to 1 within f32 rounding

    # Store only the real classes (tiny masked store beats a padded f32 round trip).
    o_ref[...] = probs[:, : o_ref.shape[1]].astype(o_ref.dtype)


def prepare_params(params, *, dtype=jnp.float32):
    """One-time weight/bias padding, hoisted out of the per-call forward path.

    Returns (prepared_params, output_size).  Hidden and class axes are padded
    to multiples of 128 lanes; padded class columns get bias -1e30 so softmax
    assigns them exactly 0 probability.
    """
    w1, b1 = params["w1"], params["b1"]
    w2, b2 = params["w2"], params["b2"]
    w3, b3 = params["w3"], params["b3"]

    in_size, hidden = w1.shape
    out_size = w3.shape[1]
    H = _round_up(hidden, 128)
    O = _round_up(out_size, 128)
    f = dtype

    w1p = jnp.zeros((in_size, H), f).at[:, :hidden].set(w1.astype(f))
    b1p = jnp.zeros((1, H), f).at[:, :hidden].set(b1.astype(f))
    w2p = jnp.zeros((H, H), f).at[:hidden, :hidden].set(w2.astype(f))
    b2p = jnp.zeros((1, H), f).at[:, :hidden].set(b2.astype(f))
    w3p = jnp.zeros((H, O), f).at[:hidden, :out_size].set(w3.astype(f))
    b3p = jnp.full((1, O), -1e30, f).at[:, :out_size].set(b3.astype(f))

    prepared = dict(w1=w1p, b1=b1p, w2=w2p, b2=b2p, w3=w3p, b3=b3p)
    return jax.tree_util.tree_map(jnp.asarray, prepared), out_size


@functools.partial(jax.jit, static_argnames=("out_size", "batch_tile"))
def prediction_nn_forward(x, prepared, *, out_size, batch_tile=1024):
    """Fused forward pass of PredictionNN.

    x: (batch, input_size) float32
    prepared: output of prepare_params() (padded, cached weights/biases)
    returns: (batch, out_size) float32 probabilities (rows sum to 1).
    """
    w1, b1 = prepared["w1"], prepared["b1"]
    w2, b2 = prepared["w2"], prepared["b2"]
    w3, b3 = prepared["w3"], prepared["b3"]

    if x.dtype != jnp.float32:
        x = x.astype(jnp.float32)

    batch, in_size = x.shape
    H = w1.shape[1]
    O = w3.shape[1]

    bt = _pick_batch_tile(batch, batch_tile)
    grid_b = pl.cdiv(batch, bt)  # ragged last block: reads padded, stores masked

    weight_bytes = sum(int(a.size) * a.dtype.itemsize
                       for a in (w1, b1, w2, b2, w3, b3))
    cost = pl.CostEstimate(
        flops=2 * batch * (in_size * H + H * H + H * O),
        transcendentals=batch * O,
        bytes_accessed=int(x.size) * x.dtype.itemsize
        + batch * out_size * 4
        + weight_bytes,
    )

    out = pl.pallas_call(
        _mlp_softmax_kernel,
        out_shape=jax.ShapeDtypeStruct((batch, out_size), jnp.float32),
        grid=(grid_b,),
        in_specs=[
            # x: pipelined over batch at its native feature width.
            pl.BlockSpec((bt, in_size), lambda i: (i, 0)),
            # Weights/biases: constant index_map -> VMEM-resident across steps.
            pl.BlockSpec((in_size, H), lambda i: (0, 0)),
            pl.BlockSpec((1, H), lambda i: (0, 0)),
            pl.BlockSpec((H, H), lambda i: (0, 0)),
            pl.BlockSpec((1, H), lambda i: (0, 0)),
            pl.BlockSpec((H, O), lambda i: (0, 0)),
            pl.BlockSpec((1, O), lambda i: (0, 0)),
        ],
        out_specs=pl.BlockSpec((bt, out_size), lambda i: (i, 0)),
        compiler_params=pltpu.CompilerParams(
            dimension_semantics=("parallel",),
        ),
        cost_estimate=cost,
    )(x, w1, b1, w2, b2, w3, b3)

    return out


def init_params(key, input_size, hidden_size=64, output_size=3):
    """Deterministic synthetic parameters (PyTorch-style uniform fan-in init)."""
    ks = jax.random.split(key, 6)

    def lin(kw, kb, fan_in, fan_out):
        bound = 1.0 / jnp.sqrt(fan_in)
        w = jax.random.uniform(kw, (fan_in, fan_out), jnp.float32, -bound, bound)
        b = jax.random.uniform(kb, (1, fan_out), jnp.float32, -bound, bound)
        return w, b

    w1, b1 = lin(ks[0], ks[1], input_size, hidden_size)
    w2, b2 = lin(ks[2], ks[3], hidden_size, hidden_size)
    w3, b3 = lin(ks[4], ks[5], hidden_size, output_size)
    return dict(w1=w1, b1=b1, w2=w2, b2=b2, w3=w3, b3=b3)


def reference_forward(x, p):
    h1 = jnp.maximum(x @ p["w1"] + p["b1"], 0.0)
    h2 = jnp.maximum(h1 @ p["w2"] + p["b2"], 0.0)
    logits = h2 @ p["w3"] + p["b3"]
    return jax.nn.softmax(logits, axis=1)


if __name__ == "__main__":
    key = jax.random.PRNGKey(0)
    k_x, k_p, k_x2 = jax.random.split(key, 3)

    batch, input_size, hidden_size, output_size = 8, 32, 64, 3
    x = jax.random.normal(k_x, (batch, input_size), dtype=jnp.float32)
    params = init_params(k_p, input_size, hidden_size, output_size)

    # Weight padding happens once, outside the per-call jitted path.
    prepared, out_size = prepare_params(params)

    out = jax.block_until_ready(
        prediction_nn_forward(x, prepared, out_size=out_size))
    ref = reference_forward(x, params)
    assert out.shape == (batch, output_size)
    assert jnp.allclose(out, ref, atol=2e-3, rtol=2e-3), "mismatch vs reference"
    assert jnp.allclose(jnp.sum(out, axis=1), 1.0, atol=1e-4), "rows must sum to 1"

    # Exercise the multi-tile pipelined path (grid > 1, ragged last batch block).
    batch2 = 200
    x2 = jax.random.normal(k_x2, (batch2, input_size), dtype=jnp.float32)
    out2 = jax.block_until_ready(
        prediction_nn_forward(x2, prepared, out_size=out_size, batch_tile=64))
    ref2 = reference_forward(x2, params)
    assert out2.shape == (batch2, output_size)
    assert jnp.allclose(out2, ref2, atol=2e-3, rtol=2e-3), "mismatch (tiled)"
    assert jnp.allclose(jnp.sum(out2, axis=1), 1.0, atol=1e-4), "rows must sum to 1"

    print("KERNEL_OK")
</pallas_src>

<mosaic_0001>
module attributes {stable_mosaic.version = 11 : i64} {
  func.func @_mlp_softmax_kernel(%arg0: i32, %arg1: memref<8x32xf32, #tpu.memory_space<vmem>>, %arg2: memref<32x128xf32, #tpu.memory_space<vmem>>, %arg3: memref<1x128xf32, #tpu.memory_space<vmem>>, %arg4: memref<128x128xf32, #tpu.memory_space<vmem>>, %arg5: memref<1x128xf32, #tpu.memory_space<vmem>>, %arg6: memref<128x128xf32, #tpu.memory_space<vmem>>, %arg7: memref<1x128xf32, #tpu.memory_space<vmem>>, %arg8: memref<8x3xf32, #tpu.memory_space<vmem>>) attributes {dimension_semantics = [#tpu.dimension_semantics<parallel>], iteration_bounds = array<i64: 1>, scalar_prefetch = 0 : i64, scratch_operands = 0 : i64, tpu.core_type = #tpu.core_type<tc>, window_params = [{transform_indices = @transform_0, window_bounds = array<i64: 8, 32>}, {pipeline_mode = #tpu.pipeline_mode<synchronous>, transform_indices = @transform_1, window_bounds = array<i64: 32, 128>}, {pipeline_mode = #tpu.pipeline_mode<synchronous>, transform_indices = @transform_2, window_bounds = array<i64: 1, 128>}, {pipeline_mode = #tpu.pipeline_mode<synchronous>, transform_indices = @transform_3, window_bounds = array<i64: 128, 128>}, {pipeline_mode = #tpu.pipeline_mode<synchronous>, transform_indices = @transform_4, window_bounds = array<i64: 1, 128>}, {pipeline_mode = #tpu.pipeline_mode<synchronous>, transform_indices = @transform_5, window_bounds = array<i64: 128, 128>}, {pipeline_mode = #tpu.pipeline_mode<synchronous>, transform_indices = @transform_6, window_bounds = array<i64: 1, 128>}, {transform_indices = @transform_7, window_bounds = array<i64: 8, 3>}]} {
    %c0 = arith.constant 0 : index
    %c0_0 = arith.constant 0 : index
    %0 = vector.load %arg1[%c0, %c0_0] : memref<8x32xf32, #tpu.memory_space<vmem>>, vector<8x32xf32>
    %c0_1 = arith.constant 0 : index
    %c0_2 = arith.constant 0 : index
    %1 = vector.load %arg2[%c0_1, %c0_2] : memref<32x128xf32, #tpu.memory_space<vmem>>, vector<32x128xf32>
    %cst = arith.constant dense<0.000000e+00> : vector<8x128xf32>
    %2 = tpu.matmul %0, %1, %cst {dimension_numbers = #tpu.dot_dimension_numbers<[1], [0], [0], [1], [0, 0, 1, 1], [], []>} : vector<8x32xf32>, vector<32x128xf32>, vector<8x128xf32> -> vector<8x128xf32>
    %c0_3 = arith.constant 0 : index
    %c0_4 = arith.constant 0 : index
    %3 = vector.load %arg3[%c0_3, %c0_4] : memref<1x128xf32, #tpu.memory_space<vmem>>, vector<1x128xf32>
    %4 = vector.broadcast %3 : vector<1x128xf32> to vector<8x128xf32>
    %5 = arith.addf %2, %4 : vector<8x128xf32>
    %cst_5 = arith.constant 0.000000e+00 : f32
    %6 = vector.broadcast %cst_5 : f32 to vector<8x128xf32>
    %7 = arith.maximumf %5, %6 : vector<8x128xf32>
    %c0_6 = arith.constant 0 : index
    %c0_7 = arith.constant 0 : index
    %8 = vector.load %arg4[%c0_6, %c0_7] : memref<128x128xf32, #tpu.memory_space<vmem>>, vector<128x128xf32>
    %cst_8 = arith.constant dense<0.000000e+00> : vector<8x128xf32>
    %9 = tpu.matmul %7, %8, %cst_8 {dimension_numbers = #tpu.dot_dimension_numbers<[1], [0], [0], [1], [0, 0, 1, 1], [], []>} : vector<8x128xf32>, vector<128x128xf32>, vector<8x128xf32> -> vector<8x128xf32>
    %c0_9 = arith.constant 0 : index
    %c0_10 = arith.constant 0 : index
    %10 = vector.load %arg5[%c0_9, %c0_10] : memref<1x128xf32, #tpu.memory_space<vmem>>, vector<1x128xf32>
    %11 = vector.broadcast %10 : vector<1x128xf32> to vector<8x128xf32>
    %12 = arith.addf %9, %11 : vector<8x128xf32>
    %cst_11 = arith.constant 0.000000e+00 : f32
    %13 = vector.broadcast %cst_11 : f32 to vector<8x128xf32>
    %14 = arith.maximumf %12, %13 : vector<8x128xf32>
    %c0_12 = arith.constant 0 : index
    %c0_13 = arith.constant 0 : index
    %15 = vector.load %arg6[%c0_12, %c0_13] : memref<128x128xf32, #tpu.memory_space<vmem>>, vector<128x128xf32>
    %cst_14 = arith.constant dense<0.000000e+00> : vector<8x128xf32>
    %16 = tpu.matmul %14, %15, %cst_14 {dimension_numbers = #tpu.dot_dimension_numbers<[1], [0], [0], [1], [0, 0, 1, 1], [], []>} : vector<8x128xf32>, vector<128x128xf32>, vector<8x128xf32> -> vector<8x128xf32>
    %c0_15 = arith.constant 0 : index
    %c0_16 = arith.constant 0 : index
    %17 = vector.load %arg7[%c0_15, %c0_16] : memref<1x128xf32, #tpu.memory_space<vmem>>, vector<1x128xf32>
    %18 = vector.broadcast %17 : vector<1x128xf32> to vector<8x128xf32>
    %19 = arith.addf %16, %18 : vector<8x128xf32>
    %cst_17 = arith.constant dense<0xFF800000> : vector<8xf32>
    %20 = vector.multi_reduction <maximumf>, %19, %cst_17 [1] : vector<8x128xf32> to vector<8xf32>
    %21 = vector.shape_cast %20 : vector<8xf32> to vector<8x1xf32>
    %22 = vector.broadcast %21 : vector<8x1xf32> to vector<8x128xf32>
    %23 = arith.subf %19, %22 : vector<8x128xf32>
    %24 = math.exp %23 : vector<8x128xf32>
    %cst_18 = arith.constant dense<0.000000e+00> : vector<8xf32>
    %25 = vector.multi_reduction <add>, %24, %cst_18 [1] : vector<8x128xf32> to vector<8xf32>
    %26 = vector.shape_cast %25 : vector<8xf32> to vector<8x1xf32>
    %27 = vector.broadcast %26 : vector<8x1xf32> to vector<8x128xf32>
    %28 = arith.divf %24, %27 : vector<8x128xf32>
    %29 = vector.extract_strided_slice %28 {offsets = [0, 0], sizes = [8, 3], strides = [1, 1]} : vector<8x128xf32> to vector<8x3xf32>
    %c0_19 = arith.constant 0 : index
    %c0_20 = arith.constant 0 : index
    %30 = vector.load %arg8[%c0_19, %c0_20] : memref<8x3xf32, #tpu.memory_space<vmem>>, vector<8x3xf32>
    tpu.vector_store %arg8[%c0_19, %c0_20], %29 {strides = array<i32>} : memref<8x3xf32, #tpu.memory_space<vmem>>, vector<8x3xf32>,
    return
  }
  func.func @transform_0(%arg0: i32) -> (i32, i32) {
    %c0_i32 = arith.constant 0 : i32
    %c0_i32_0 = arith.constant 0 : i32
    return %arg0, %c0_i32 : i32, i32
  }
  func.func @transform_1(%arg0: i32) -> (i32, i32) {
    %c0_i32 = arith.constant 0 : i32
    %c0_i32_0 = arith.constant 0 : i32
    %c0_i32_1 = arith.constant 0 : i32
    return %c0_i32, %c0_i32_0 : i32, i32
  }
  func.func @transform_2(%arg0: i32) -> (i32, i32) {
    %c0_i32 = arith.constant 0 : i32
    %c0_i32_0 = arith.constant 0 : i32
    %c0_i32_1 = arith.constant 0 : i32
    return %c0_i32, %c0_i32_0 : i32, i32
  }
  func.func @transform_3(%arg0: i32) -> (i32, i32) {
    %c0_i32 = arith.constant 0 : i32
    %c0_i32_0 = arith.constant 0 : i32
    %c0_i32_1 = arith.constant 0 : i32
    return %c0_i32, %c0_i32_0 : i32, i32
  }
  func.func @transform_4(%arg0: i32) -> (i32, i32) {
    %c0_i32 = arith.constant 0 : i32
    %c0_i32_0 = arith.constant 0 : i32
    %c0_i32_1 = arith.constant 0 : i32
    return %c0_i32, %c0_i32_0 : i32, i32
  }
  func.func @transform_5(%arg0: i32) -> (i32, i32) {
    %c0_i32 = arith.constant 0 : i32
    %c0_i32_0 = arith.constant 0 : i32
    %c0_i32_1 = arith.constant 0 : i32
    return %c0_i32, %c0_i32_0 : i32, i32
  }
  func.func @transform_6(%arg0: i32) -> (i32, i32) {
    %c0_i32 = arith.constant 0 : i32
    %c0_i32_0 = arith.constant 0 : i32
    %c0_i32_1 = arith.constant 0 : i32
    return %c0_i32, %c0_i32_0 : i32, i32
  }
  func.func @transform_7(%arg0: i32) -> (i32, i32) {
    %c0_i32 = arith.constant 0 : i32
    %c0_i32_0 = arith.constant 0 : i32
    return %arg0, %c0_i32 : i32, i32
  }
}

</mosaic_0001>

<bundles_post_ra>
// kernel: prediction_nn_forward.1
= control target key start
LH: loop header
LB: loop body
LE: loop exit
PB: predicated region body
PF: predicated region fallthrough
CT: control target
= control target key end

     0   :  { %12 = vsyncpa [#allocation3], 0  ;;  %s716_s0 = inlined_call_operand.hbm [shape: f32[8,32], index: 0, kind: input, shape index: {}]   ;;  %s717_s1 = inlined_call_operand.hbm [shape: f32[32,128], index: 1, kind: input, shape index: {}]   ;;  %s718_s2 = inlined_call_operand.vmem [shape: f32[1,128], index: 2, kind: input, shape index: {}]   ;;  %s719_s3 = inlined_call_operand.hbm [shape: f32[128,128], index: 3, kind: input, shape index: {}]   ;;  %s720_s4 = inlined_call_operand.vmem [shape: f32[1,128], index: 4, kind: input, shape index: {}]   ;;  %s721_s5 = inlined_call_operand.hbm [shape: f32[128,128], index: 5, kind: input, shape index: {}]   ;;  %s722_s6 = inlined_call_operand.vmem [shape: f32[1,128], index: 6, kind: input, shape index: {}]   ;;  %s723_s7 = inlined_call_operand.vmem [shape: f32[8,3], index: 7, kind: output, shape index: {}]  }
   0x1   :  { %13 = vsyncpa [#allocation5], 0 }
   0x2   :  { %14 = vsyncpa [#allocation8], 0  ;;  %s593_s24 = smov [#allocation4]  }
   0x3   :  { %s30_s25 = sshll.u32 %s593_s24, 4  ;;  %s31_s25 = int_to_ptr.vmem [resolvable:$true] %s30_s25 }
   0x4   :  { %s515_s26 = scalar_lea.vmem %s31_s25, 512  ;;  %p520_p1 = scmp.lt.s32.totalorder %s31_s25, %s31_s25 }
   0x5   :  { %p516_p0 = scmp.ne.s32.totalorder %s31_s25, %s515_s26  ;;  %p521_p2 = scmp.lt.s32.totalorder %s515_s26, %s515_s26 }
   0x7   :  { %p522_p3 = por %p521_p2, %p520_p1 }
   0x9   :  { %p523_p4 = pnand %p522_p3, %p516_p0 }
   0xb   :  { %526 = shalt.err (!%p523_p4)
}
   0xc   :  { %s594_s27 = smov 128   ;;  %s595_s28 = smov 8  }
   0xd   :  { %36 = dma.hbm_to_vmem [thread:$0]  %s717_s1, 512, %s31_s25, [#allocation5], %s594_s27, %s594_s27, %s595_s28  }
   0xe   :  { %s596_s8 = smov [#allocation2]   ;;  %s597_s10 = smov [#allocation6]  }
   0xf   :  { %s21_s9 = sshll.u32 %s596_s8, 4  ;;  %s44_s11 = sshll.u32 %s597_s10, 4  ;;  %s22_s9 = int_to_ptr.vmem [resolvable:$true] %s21_s9  ;;  %s45_s11 = int_to_ptr.vmem [resolvable:$true] %s44_s11 }
  0x10   :  { %s535_s12 = scalar_lea.vmem %s22_s9, 128  ;;  %p540_p6 = scmp.lt.s32.totalorder %s22_s9, %s22_s9 }
  0x11   :  { %p536_p5 = scmp.ne.s32.totalorder %s22_s9, %s535_s12  ;;  %p541_p7 = scmp.lt.s32.totalorder %s535_s12, %s535_s12 }
  0x13   :  { %p542_p8 = por %p541_p7, %p540_p6 }
  0x15   :  { %p543_p9 = pnand %p542_p8, %p536_p5 }
  0x17   :  { %546 = shalt.err (!%p543_p9)
}
  0x18   :  { %24 = dma.hbm_to_vmem [thread:$0]  %s716_s0, 128, %s22_s9, [#allocation3]  }
  0x19   :  { %s555_s15 = scalar_lea.vmem %s45_s11, 2048  ;;  %p560_p11 = scmp.lt.s32.totalorder %s45_s11, %s45_s11 }
  0x1a   :  { %p556_p10 = scmp.ne.s32.totalorder %s45_s11, %s555_s15  ;;  %p561_p12 = scmp.lt.s32.totalorder %s555_s15, %s555_s15 }
  0x1c   :  { %p562_p13 = por %p561_p12, %p560_p11 }
  0x1e   :  { %p563_p0 = pnand %p562_p13, %p556_p10 }
  0x20   :  { %566 = shalt.err (!%p563_p0)
}
  0x21   :  { %50 = dma.hbm_to_vmem [thread:$0]  %s719_s3, 2048, %s45_s11, [#allocation5], %s594_s27, %s594_s27, %s595_s28  }
  0x22   :  { %s598_s17 = smov [#allocation7]  }
  0x23   :  { %s58_s18 = sshll.u32 %s598_s17, 4  ;;  %s59_s18 = int_to_ptr.vmem [resolvable:$true] %s58_s18 }
  0x24   :  { %s575_s19 = scalar_lea.vmem %s59_s18, 2048  ;;  %p580_p2 = scmp.lt.s32.totalorder %s59_s18, %s59_s18 }
  0x25   :  { %p576_p1 = scmp.ne.s32.totalorder %s59_s18, %s575_s19  ;;  %p581_p3 = scmp.lt.s32.totalorder %s575_s19, %s575_s19 }
  0x27   :  { %p582_p4 = por %p581_p3, %p580_p2 }
  0x29   :  { %p583_p5 = pnand %p582_p4, %p576_p1 }
  0x2b   :  { %586 = shalt.err (!%p583_p5)
}
  0x2c   :  { %64 = dma.hbm_to_vmem [thread:$0]  %s721_s5, 2048, %s59_s18, [#allocation8], %s594_s27, %s594_s27, %s595_s28  }
  0x2d   :  { %587 = dma.done.wait [#allocation3], 128  }
  0x2e   :  { %588 = vsyncadd [#allocation3], 4294967168 }
  0x2f   :  { %589 = dma.done.wait [#allocation5], 2560  }
  0x30   :  { %590 = vsyncadd [#allocation5], 4294964736 }
  0x31   :  { %591 = dma.done.wait [#allocation8], 2048  }
  0x32   :  { %592 = vsyncadd [#allocation8], 4294965248  ;;  %v599_v0 = vmov 0.0   ;;  %vm600_vm0 = vmmov 0   ;;  %v83_v1 = vld [vmem:[#allocation4 + $0x18] sm:$0xff]  ;;  %v82_v2 = vld [vmem:[#allocation4 + $0x10] sm:$0xff] }
  0x33   :  { %414 = vmatprep.subr.mxu0 %v599_v0  ;;  %422 = vmatprep.mubr.msk.f32.mxu0 %vm600_vm0, %v599_v0  ;;  %v181_v3 = vld [vmem:[#allocation6 + $0x78] sm:$0xff]  ;;  %v81_v4 = vld [vmem:[#allocation4 + $0x8] sm:$0xff]  ;;  %v180_v5 = vld [vmem:[#allocation6 + $0x70] sm:$0xff]  ;;  %vm91_vm1 = vcmask 261120   ;;  %vm362_vm2 = vcmask 23552  }
  0x34   :  { %425 = vmatprep.subr.mxu1 %v599_v0  ;;  %457 = vmatprep.mubr.msk.f32.mxu1 %vm600_vm0, %v599_v0  ;;  %v179_v6 = vld [vmem:[#allocation6 + $0x68] sm:$0xff]  ;;  %v80_v7 = vld [vmem:[#allocation4] sm:$0xff]  ;;  %v79_v8 = vld [vmem:[#allocation2] sm:$0xff] }
  0x35   :  { %415 = vmatpush3.msra.mxu0 %v83_v1  ;;  %426 = vmatpush3.msra.mxu1 %v181_v3  ;;  %v178_v9 = vld [vmem:[#allocation6 + $0x60] sm:$0xff]  ;;  %v177_v10 = vld [vmem:[#allocation6 + $0x58] sm:$0xff]  ;;  %v176_v11 = vld [vmem:[#allocation6 + $0x50] sm:$0xff] }
  0x36   :  { %416 = vmatprep.subr.mxu0 %v599_v0  ;;  %427 = vmatprep.subr.mxu1 %v599_v0  ;;  %v175_v12 = vld [vmem:[#allocation6 + $0x48] sm:$0xff]  ;;  %v174_v13 = vld [vmem:[#allocation6 + $0x40] sm:$0xff]  ;;  %v173_v14 = vld [vmem:[#allocation6 + $0x38] sm:$0xff] }
  0x37   :  { %417 = vmatpush3.msra.mxu0 %v82_v2  ;;  %428 = vmatpush3.msra.mxu1 %v180_v5  ;;  %v172_v15 = vld [vmem:[#allocation6 + $0x30] sm:$0xff]  ;;  %v171_v16 = vld [vmem:[#allocation6 + $0x28] sm:$0xff]  ;;  %v170_v17 = vld [vmem:[#allocation6 + $0x20] sm:$0xff] }
  0x38   :  { %418 = vmatprep.subr.mxu0 %v599_v0  ;;  %429 = vmatprep.subr.mxu1 %v599_v0  ;;  %v169_v18 = vld [vmem:[#allocation6 + $0x18] sm:$0xff]  ;;  %v168_v19 = vld [vmem:[#allocation6 + $0x10] sm:$0xff]  ;;  %v167_v20 = vld [vmem:[#allocation6 + $0x8] sm:$0xff] }
  0x39   :  { %419 = vmatpush3.msra.mxu0 %v81_v4  ;;  %430 = vmatpush3.msra.mxu1 %v179_v6  ;;  %v166_v21 = vld [vmem:[#allocation6] sm:$0xff]  ;;  %v275_v22 = vld [vmem:[#allocation7 + $0x78] sm:$0xff]  ;;  %v274_v23 = vld [vmem:[#allocation7 + $0x70] sm:$0xff] }
  0x3a   :  { %420 = vmatprep.subr.mxu0 %v599_v0  ;;  %431 = vmatprep.subr.mxu1 %v599_v0  ;;  %v273_v24 = vld [vmem:[#allocation7 + $0x68] sm:$0xff]  ;;  %v272_v25 = vld [vmem:[#allocation7 + $0x60] sm:$0xff]  ;;  %v271_v26 = vld [vmem:[#allocation7 + $0x58] sm:$0xff] }
  0x3b   :  { %421 = vmatpush3.msra.mxu0 %v80_v7  ;;  %432 = vmatpush3.msra.mxu1 %v178_v9  ;;  %v270_v27 = vld [vmem:[#allocation7 + $0x50] sm:$0xff]  ;;  %v269_v28 = vld [vmem:[#allocation7 + $0x48] sm:$0xff]  ;;  %v268_v29 = vld [vmem:[#allocation7 + $0x40] sm:$0xff] }
  0x3c   :  { %423 = vmatmul.mubr.msk.f32.vlgmr.msra.gmra.mxu0 %vm91_vm1, %v79_v8  ;;  %433 = vmatprep.subr.mxu1 %v599_v0  ;;  %v267_v30 = vld [vmem:[#allocation7 + $0x38] sm:$0xff]  ;;  %v266_v31 = vld [vmem:[#allocation7 + $0x30] sm:$0xff]  ;;  %v265_v32 = vld [vmem:[#allocation7 + $0x28] sm:$0xff] }
  0x3d   :  { %460 = vmatprep.subr.mxu0 %v599_v0  ;;  %434 = vmatpush3.msra.mxu1 %v177_v10  ;;  %v264_v33 = vld [vmem:[#allocation7 + $0x20] sm:$0xff]  ;;  %v263_v34 = vld [vmem:[#allocation7 + $0x18] sm:$0xff]  ;;  %v262_v40 = vld [vmem:[#allocation7 + $0x10] sm:$0xff] }
  0x3e   :  { %492 = vmatprep.mubr.msk.f32.mxu0 %vm600_vm0, %v599_v0  ;;  %435 = vmatprep.subr.mxu1 %v599_v0  ;;  %v371_v35 = vld [vmem:[%s718_s2] ss:$0 sm:$0xff]  ;;  %v261_v41 = vld [vmem:[#allocation7 + $0x8] sm:$0xff]  ;;  %v260_v42 = vld [vmem:[#allocation7] sm:$0xff] }
  0x3f   :  { %436 = vmatpush3.msra.mxu1 %v176_v11  ;;  %461 = vmatpush3.msra.mxu0 %v275_v22  ;;  %v373_v43 = vld [vmem:[%s720_s4] ss:$0 sm:$0xff] }
  0x40   :  { %437 = vmatprep.subr.mxu1 %v599_v0  ;;  %462 = vmatprep.subr.mxu0 %v599_v0  ;;  %v374_v48 = vld [vmem:[%s722_s6] ss:$0 sm:$0xff] }
  0x41   :  { %438 = vmatpush3.msra.mxu1 %v175_v12  ;;  %463 = vmatpush3.msra.mxu0 %v274_v23 }
  0x42   :  { %439 = vmatprep.subr.mxu1 %v599_v0  ;;  %464 = vmatprep.subr.mxu0 %v599_v0 }
  0x43   :  { %440 = vmatpush3.msra.mxu1 %v174_v13  ;;  %465 = vmatpush3.msra.mxu0 %v273_v24 }
  0x44   :  { %441 = vmatprep.subr.mxu1 %v599_v0  ;;  %466 = vmatprep.subr.mxu0 %v599_v0 }
  0x45   :  { %442 = vmatpush3.msra.mxu1 %v173_v14  ;;  %467 = vmatpush3.msra.mxu0 %v272_v25 }
  0x46   :  { %443 = vmatprep.subr.mxu1 %v599_v0  ;;  %468 = vmatprep.subr.mxu0 %v599_v0 }
  0x47   :  { %444 = vmatpush3.msra.mxu1 %v172_v15  ;;  %469 = vmatpush3.msra.mxu0 %v271_v26 }
  0x48   :  { %445 = vmatprep.subr.mxu1 %v599_v0  ;;  %470 = vmatprep.subr.mxu0 %v599_v0 }
  0x49   :  { %446 = vmatpush3.msra.mxu1 %v171_v16  ;;  %471 = vmatpush3.msra.mxu0 %v270_v27 }
  0x4a   :  { %447 = vmatprep.subr.mxu1 %v599_v0  ;;  %472 = vmatprep.subr.mxu0 %v599_v0 }
  0x4b   :  { %448 = vmatpush3.msra.mxu1 %v170_v17  ;;  %473 = vmatpush3.msra.mxu0 %v269_v28 }
  0x4c   :  { %449 = vmatprep.subr.mxu1 %v599_v0  ;;  %474 = vmatprep.subr.mxu0 %v599_v0 }
  0x4d   :  { %450 = vmatpush3.msra.mxu1 %v169_v18  ;;  %475 = vmatpush3.msra.mxu0 %v268_v29 }
  0x4e   :  { %451 = vmatprep.subr.mxu1 %v599_v0  ;;  %476 = vmatprep.subr.mxu0 %v599_v0 }
  0x4f   :  { %452 = vmatpush3.msra.mxu1 %v168_v19  ;;  %477 = vmatpush3.msra.mxu0 %v267_v30 }
  0x50   :  { %453 = vmatprep.subr.mxu1 %v599_v0  ;;  %478 = vmatprep.subr.mxu0 %v599_v0 }
  0x51   :  { %454 = vmatpush3.msra.mxu1 %v167_v20  ;;  %479 = vmatpush3.msra.mxu0 %v266_v31 }
  0x52   :  { %455 = vmatprep.subr.mxu1 %v599_v0  ;;  %480 = vmatprep.subr.mxu0 %v599_v0 }
  0x53   :  { %456 = vmatpush3.msra.mxu1 %v166_v21  ;;  %481 = vmatpush3.msra.mxu0 %v265_v32 }
  0x54   :  { %482 = vmatprep.subr.mxu0 %v599_v0 }
  0x55   :  { %483 = vmatpush3.msra.mxu0 %v264_v33 }
  0x56   :  { %484 = vmatprep.subr.mxu0 %v599_v0 }
  0x57   :  { %485 = vmatpush3.msra.mxu0 %v263_v34 }
  0x58   :  { %486 = vmatprep.subr.mxu0 %v599_v0 }
  0x59   :  { %487 = vmatpush3.msra.mxu0 %v262_v40 }
  0x5a   :  { %488 = vmatprep.subr.mxu0 %v599_v0 }
  0x5b   :  { %489 = vmatpush3.msra.mxu0 %v261_v41 }
  0x5c   :  { %490 = vmatprep.subr.mxu0 %v599_v0 }
  0x5d   :  { %491 = vmatpush3.msra.mxu0 %v260_v42 }
  0xfc   :  { %v161_v36 = vpop.f32.mrf.mxu0 }
  0xfd   :  { %v162_v37 = vadd.f32 %v371_v35, %v161_v36 }
  0xfe   :  { %v424_v38 = vpop.f32.mrf.mxu0 }
  0xff   :  { %v165_v39 = vmax.f32 %v162_v37, 0.0 }
 0x101   :  { %458 = vmatmul.mubr.f32.vlgmr.msra.gmra.mxu1 %v165_v39 }
 0x1c1   :  { %v255_v44 = vpop.f32.mrf.mxu1 }
 0x1c2   :  { %v256_v45 = vadd.f32 %v373_v43, %v255_v44 }
 0x1c3   :  { %v459_v46 = vpop.f32.mrf.mxu1 }
 0x1c4   :  { %v259_v47 = vmax.f32 %v256_v45, 0.0 }
 0x1c6   :  { %493 = vmatmul.mubr.f32.vlgmr.msra.gmra.mxu0 %v259_v47 }
 0x286   :  { %v349_v49 = vpop.f32.mrf.mxu0 }
 0x287   :  { %v350_v50 = vadd.f32 %v374_v48, %v349_v49 }
 0x288   :  { %v494_v51 = vpop.f32.mrf.mxu0 }
 0x289   :  { %353 = vmax.xlane.f32.xlu0 %v350_v50 }
 0x312   :  { %v354_v52 = vpop.xlane.xlu0 %353 }
 0x313   :  { %v355_v53 = vsub.f32 %v350_v50, %v354_v52 }
 0x315   :  { %v356_v54 = vmul.f32 1.442695, %v355_v53 }
 0x317   :  { %503 = vpow2.f32 %v356_v54 }
 0x324   :  { %v504_v55 = vpop.eup %503 }
 0x325   :  { %358 = vadd.xlane.f32.xlu0 %v504_v55 }
 0x3ae   :  { %v359_v56 = vpop.xlane.xlu0 %358 }
 0x3af   :  { %505 = vrcp.f32 %v359_v56 }
 0x3bc   :  { %v506_v57 = vpop.eup %505 }
 0x3bd   :  { %v361_v58 = vmul.f32 %v506_v57, %v504_v55 }
 0x3bf   :  { %363 = vst.msk [vmem:[%s723_s7] sm:$0xff] %vm362_vm2, %v361_v58 }
 0x3c0   :  { %368 = vsyncpa [#allocation3], 1 }
 0x3c1   :  { %369 = vsyncpa [#allocation5], 1 }
 0x3c2   :  { %370 = vsyncpa [#allocation8], 1 }

</bundles_post_ra>
